<compile_context>
chip_gen: v5e
topology: v5e:2x2
jax: 0.10.0
libtpu: 0.0.40
codegen_flags: <defaults>
</compile_context>

<pallas_src>
import functools

import jax
import jax.numpy as jnp
from jax.experimental import pallas as pl
from jax.experimental.pallas import tpu as pltpu


def _pow_gamma(base, gamma):
    """base**gamma via repeated multiply when gamma is a small integer
    (matches torch.pow for slightly-negative bases, avoids exp/log NaNs)."""
    g = float(gamma)
    if g.is_integer() and 0 <= g <= 8:
        out = jnp.ones_like(base)
        for _ in range(int(g)):
            out = out * base
        return out
    return jnp.power(jnp.maximum(base, 0.0), gamma)


def _focal_loss_kernel(x_ref, t_ref, alpha_ref, loss_ref, acc_f_ref, acc_a_ref,
                       *, gamma, epsilon, num_class, hw, block_hw, inv_m):
    # x_ref:     (1, C, BLOCK_HW)  logits block (native layout, HW lane-dense)
    # t_ref:     (1, 1, BLOCK_HW)  int32 class indices
    # alpha_ref: (C,) f32 per-class weights, resident in SMEM
    # loss_ref:  (1, 1) f32 scalar output (written on the last grid step only)
    # acc_*_ref: (1, 1) f32 running-sum scratch, persistent across the grid
    n_i = pl.program_id(0)
    hw_i = pl.program_id(1)
    is_first = jnp.logical_and(n_i == 0, hw_i == 0)
    is_last = jnp.logical_and(n_i == pl.num_programs(0) - 1,
                              hw_i == pl.num_programs(1) - 1)

    @pl.when(is_first)
    def _():
        acc_f_ref[...] = jnp.zeros_like(acc_f_ref)
        acc_a_ref[...] = jnp.zeros_like(acc_a_ref)

    x = x_ref[0].astype(jnp.float32)          # (C, T); cast in-kernel (bf16 ok)
    t = t_ref[0]                              # (1, T) int32

    # Valid-lane mask for a possibly padded last HW tile (use where, not *,
    # so garbage/NaN in the padded region cannot poison the sums).
    col = jax.lax.broadcasted_iota(jnp.int32, t.shape, 1) + hw_i * block_hw
    valid = col < hw                          # (1, T) bool

    # Per-class lane-dense planes; softmax over C is an unrolled VPU max/add.
    planes = [x[c:c + 1, :] for c in range(num_class)]     # each (1, T)
    m = planes[0]
    for c in range(1, num_class):
        m = jnp.maximum(m, planes[c])
    den = jnp.exp(planes[0] - m)
    for c in range(1, num_class):
        den = den + jnp.exp(planes[c] - m)

    # Gather target-class logit and alpha[target] with per-class selects
    # (C is tiny: no MXU one-hot matmul, no cross-lane gather).
    x_t = jnp.zeros_like(m)
    a_t = jnp.zeros_like(m)
    for c in range(num_class):
        sel = t == c
        x_t = jnp.where(sel, planes[c], x_t)
        a_t = jnp.where(sel, alpha_ref[c], a_t)

    prob = jnp.exp(x_t - m) / den             # softmax prob of the target class
    pt = prob + epsilon                       # module adds eps before the log
    logpt = jnp.log(pt)
    focal = -_pow_gamma(1.0 - pt, gamma) * logpt            # (1, T)

    zero = jnp.zeros_like(focal)
    acc_f_ref[...] += jnp.sum(jnp.where(valid, focal, zero), axis=1, keepdims=True)
    acc_a_ref[...] += jnp.sum(jnp.where(valid, a_t, zero), axis=1, keepdims=True)

    @pl.when(is_last)
    def _():
        # mean(alpha[target]) * mean(focal)  ==  PyTorch broadcast-then-mean.
        loss_ref[...] = (acc_a_ref[...] * inv_m) * (acc_f_ref[...] * inv_m)


def focal_loss_pallas(logits, target, alpha, gamma=2.0, epsilon=1e-10,
                      block_hw=16384):
    """logits: (N, C, H, W) or (N, C, L); target: matching spatial shape."""
    N, C = logits.shape[0], logits.shape[1]
    x3 = logits.reshape(N, C, -1)                        # (N, C, HW): free reshape
    HW = x3.shape[2]
    t3 = target.reshape(N, 1, -1).astype(jnp.int32)      # (N, 1, HW)
    a1 = alpha.reshape(-1).astype(jnp.float32)           # (C,), lives in SMEM

    if HW % 128 == 0:
        bhw = max(128, min((int(block_hw) // 128) * 128, HW))
    else:
        bhw = HW   # lane dim == full array extent is always a legal block
    n_hw_tiles = pl.cdiv(HW, bhw)
    inv_m = 1.0 / float(N * HW)

    kernel = functools.partial(
        _focal_loss_kernel, gamma=gamma, epsilon=epsilon, num_class=C,
        hw=HW, block_hw=bhw, inv_m=inv_m)

    out = pl.pallas_call(
        kernel,
        out_shape=jax.ShapeDtypeStruct((1, 1), jnp.float32),
        grid_spec=pltpu.PrefetchScalarGridSpec(
            num_scalar_prefetch=0,
            grid=(N, n_hw_tiles),
            in_specs=[
                pl.BlockSpec((1, C, bhw), lambda n, h: (n, 0, h)),
                pl.BlockSpec((1, 1, bhw), lambda n, h: (n, 0, h)),
                pl.BlockSpec(memory_space=pltpu.MemorySpace.SMEM),
            ],
            out_specs=pl.BlockSpec((1, 1), lambda n, h: (0, 0)),
            scratch_shapes=[pltpu.VMEM((1, 1), jnp.float32),
                            pltpu.VMEM((1, 1), jnp.float32)],
        ),
        compiler_params=pltpu.CompilerParams(
            # Both grid axes feed the same scalar accumulators -> serial reduction.
            # TODO(synk): megacore split over N with per-core partial sums (v7x).
            dimension_semantics=("arbitrary", "arbitrary"),
            vmem_limit_bytes=32 * 1024 * 1024,
        ),
    )(x3, t3, a1)
    return out[0, 0]


def _reference_focal_loss(logits, target, alpha, gamma=2.0, epsilon=1e-10):
    # Pure-JAX reference reproducing the PyTorch broadcast-then-mean exactly.
    N, C = logits.shape[0], logits.shape[1]
    prob = jax.nn.softmax(logits.astype(jnp.float32), axis=1)
    prob = prob.reshape(N, C, -1).transpose(0, 2, 1).reshape(-1, C)
    t = target.reshape(-1).astype(jnp.int32)
    one_hot = jax.nn.one_hot(t, C, dtype=jnp.float32)
    pt = jnp.sum(one_hot * prob, axis=1) + epsilon          # (M,)
    logpt = jnp.log(pt)
    a = alpha.reshape(-1)[t]                                # (M,)
    focal = -_pow_gamma(1.0 - pt, gamma) * logpt            # (M,)
    # (M,1,1) * (M,) -> (M,1,M), then mean over everything
    loss = a[:, None, None] * focal[None, None, :]
    return jnp.mean(loss)


if __name__ == "__main__":
    num_class = 5
    alpha_scalar, gamma, balance_index = 0.25, 2.0, -1

    # Module __init__ for float alpha: ones(C) * (1 - 0.25); alpha[-1] = 0.25
    alpha = jnp.full((num_class,), 1.0 - alpha_scalar, dtype=jnp.float32)
    alpha = alpha.at[balance_index].set(alpha_scalar)

    key = jax.random.PRNGKey(0)
    kx, kt = jax.random.split(key)
    x = jax.random.normal(kx, (2, num_class, 16, 16), dtype=jnp.float32)   # NCHW
    target = jax.random.randint(kt, (2, 16, 16), 0, num_class)

    # block_hw=128 -> grid (N=2, HW_tiles=2): exercises tiling + accumulation.
    loss = focal_loss_pallas(x, target, alpha, gamma=gamma, block_hw=128)
    loss = jax.block_until_ready(loss)

    ref = jax.block_until_ready(_reference_focal_loss(x, target, alpha, gamma=gamma))
    assert jnp.allclose(loss, ref, rtol=1e-4, atol=1e-6), (loss, ref)

    print("KERNEL_OK")
</pallas_src>

<mosaic_0001>
module attributes {stable_mosaic.version = 11 : i64} {
  func.func @_focal_loss_kernel(%arg0: i32, %arg1: i32, %arg2: memref<1x5x128xf32, #tpu.memory_space<vmem>>, %arg3: memref<1x1x128xi32, #tpu.memory_space<vmem>>, %arg4: memref<5xf32, #tpu.memory_space<smem>>, %arg5: memref<1x1xf32, #tpu.memory_space<vmem>>, %arg6: memref<1x1xf32, #tpu.memory_space<vmem>>, %arg7: memref<1x1xf32, #tpu.memory_space<vmem>>) attributes {dimension_semantics = [#tpu.dimension_semantics<arbitrary>, #tpu.dimension_semantics<arbitrary>], iteration_bounds = array<i64: 2, 2>, scalar_prefetch = 0 : i64, scratch_operands = 2 : i64, tpu.core_type = #tpu.core_type<tc>, window_params = [{transform_indices = @transform_0, window_bounds = array<i64: 1, 5, 128>}, {transform_indices = @transform_1, window_bounds = array<i64: 1, 1, 128>}, {transform_indices = @transform_2, window_bounds = array<i64: 5>}, {pipeline_mode = #tpu.pipeline_mode<synchronous>, transform_indices = @transform_3, window_bounds = array<i64: 1, 1>}]} {
    %c0_i32 = arith.constant 0 : i32
    %0 = arith.cmpi eq, %arg0, %c0_i32 : i32
    %c0_i32_0 = arith.constant 0 : i32
    %1 = arith.cmpi eq, %arg1, %c0_i32_0 : i32
    %2 = arith.andi %0, %1 : i1
    %c1_i32 = arith.constant 1 : i32
    %3 = arith.cmpi eq, %arg0, %c1_i32 : i32
    %c1_i32_1 = arith.constant 1 : i32
    %4 = arith.cmpi eq, %arg1, %c1_i32_1 : i32
    %5 = arith.andi %3, %4 : i1
    %6 = arith.extui %2 : i1 to i32
    %c0_i32_2 = arith.constant 0 : i32
    %7 = arith.cmpi ne, %6, %c0_i32_2 : i32
    scf.if %7 {
      %cst_28 = arith.constant 0.000000e+00 : f32
      %102 = vector.broadcast %cst_28 : f32 to vector<1x1xf32>
      %c0_29 = arith.constant 0 : index
      %c0_30 = arith.constant 0 : index
      %103 = vector.load %arg6[%c0_29, %c0_30] : memref<1x1xf32, #tpu.memory_space<vmem>>, vector<1x1xf32>
      tpu.vector_store %arg6[%c0_29, %c0_30], %102 {strides = array<i32>} : memref<1x1xf32, #tpu.memory_space<vmem>>, vector<1x1xf32>,
      %cst_31 = arith.constant 0.000000e+00 : f32
      %104 = vector.broadcast %cst_31 : f32 to vector<1x1xf32>
      %c0_32 = arith.constant 0 : index
      %c0_33 = arith.constant 0 : index
      %105 = vector.load %arg7[%c0_32, %c0_33] : memref<1x1xf32, #tpu.memory_space<vmem>>, vector<1x1xf32>
      tpu.vector_store %arg7[%c0_32, %c0_33], %104 {strides = array<i32>} : memref<1x1xf32, #tpu.memory_space<vmem>>, vector<1x1xf32>,
    } else {
    }
    %c0 = arith.constant 0 : index
    %c0_3 = arith.constant 0 : index
    %c0_4 = arith.constant 0 : index
    %8 = vector.load %arg2[%c0, %c0_3, %c0_4] : memref<1x5x128xf32, #tpu.memory_space<vmem>>, vector<1x5x128xf32>
    %9 = vector.shape_cast %8 : vector<1x5x128xf32> to vector<5x128xf32>
    %c0_5 = arith.constant 0 : index
    %c0_6 = arith.constant 0 : index
    %c0_7 = arith.constant 0 : index
    %10 = vector.load %arg3[%c0_5, %c0_6, %c0_7] : memref<1x1x128xi32, #tpu.memory_space<vmem>>, vector<1x1x128xi32>
    %11 = vector.shape_cast %10 : vector<1x1x128xi32> to vector<1x128xi32>
    %12 = tpu.iota {dimensions = array<i32: 1>} : vector<1x128xi32>
    %c128_i32 = arith.constant 128 : i32
    %13 = arith.muli %arg1, %c128_i32 : i32
    %14 = vector.broadcast %13 : i32 to vector<1x128xi32>
    %15 = arith.addi %12, %14 : vector<1x128xi32>
    %c256_i32 = arith.constant 256 : i32
    %16 = vector.broadcast %c256_i32 : i32 to vector<1x128xi32>
    %17 = arith.cmpi slt, %15, %16 : vector<1x128xi32>
    %18 = vector.extract_strided_slice %9 {offsets = [0, 0], sizes = [1, 128], strides = [1, 1]} : vector<5x128xf32> to vector<1x128xf32>
    %19 = vector.extract_strided_slice %9 {offsets = [1, 0], sizes = [1, 128], strides = [1, 1]} : vector<5x128xf32> to vector<1x128xf32>
    %20 = vector.extract_strided_slice %9 {offsets = [2, 0], sizes = [1, 128], strides = [1, 1]} : vector<5x128xf32> to vector<1x128xf32>
    %21 = vector.extract_strided_slice %9 {offsets = [3, 0], sizes = [1, 128], strides = [1, 1]} : vector<5x128xf32> to vector<1x128xf32>
    %22 = vector.extract_strided_slice %9 {offsets = [4, 0], sizes = [1, 128], strides = [1, 1]} : vector<5x128xf32> to vector<1x128xf32>
    %23 = arith.maximumf %18, %19 : vector<1x128xf32>
    %24 = arith.maximumf %23, %20 : vector<1x128xf32>
    %25 = arith.maximumf %24, %21 : vector<1x128xf32>
    %26 = arith.maximumf %25, %22 : vector<1x128xf32>
    %27 = arith.subf %18, %26 : vector<1x128xf32>
    %28 = math.exp %27 : vector<1x128xf32>
    %29 = arith.subf %19, %26 : vector<1x128xf32>
    %30 = math.exp %29 : vector<1x128xf32>
    %31 = arith.addf %28, %30 : vector<1x128xf32>
    %32 = arith.subf %20, %26 : vector<1x128xf32>
    %33 = math.exp %32 : vector<1x128xf32>
    %34 = arith.addf %31, %33 : vector<1x128xf32>
    %35 = arith.subf %21, %26 : vector<1x128xf32>
    %36 = math.exp %35 : vector<1x128xf32>
    %37 = arith.addf %34, %36 : vector<1x128xf32>
    %38 = arith.subf %22, %26 : vector<1x128xf32>
    %39 = math.exp %38 : vector<1x128xf32>
    %40 = arith.addf %37, %39 : vector<1x128xf32>
    %cst = arith.constant 0.000000e+00 : f32
    %41 = vector.broadcast %cst : f32 to vector<1x128xf32>
    %cst_8 = arith.constant 0.000000e+00 : f32
    %42 = vector.broadcast %cst_8 : f32 to vector<1x128xf32>
    %c0_i32_9 = arith.constant 0 : i32
    %43 = vector.broadcast %c0_i32_9 : i32 to vector<1x128xi32>
    %44 = arith.cmpi eq, %11, %43 : vector<1x128xi32>
    %45 = arith.select %44, %18, %41 : vector<1x128xi1>, vector<1x128xf32>
    %c0_10 = arith.constant 0 : index
    %46 = memref.load %arg4[%c0_10] : memref<5xf32, #tpu.memory_space<smem>>
    %47 = vector.broadcast %46 : f32 to vector<1x128xf32>
    %48 = arith.select %44, %47, %42 : vector<1x128xi1>, vector<1x128xf32>
    %c1_i32_11 = arith.constant 1 : i32
    %49 = vector.broadcast %c1_i32_11 : i32 to vector<1x128xi32>
    %50 = arith.cmpi eq, %11, %49 : vector<1x128xi32>
    %51 = arith.select %50, %19, %45 : vector<1x128xi1>, vector<1x128xf32>
    %c1 = arith.constant 1 : index
    %52 = memref.load %arg4[%c1] : memref<5xf32, #tpu.memory_space<smem>>
    %53 = vector.broadcast %52 : f32 to vector<1x128xf32>
    %54 = arith.select %50, %53, %48 : vector<1x128xi1>, vector<1x128xf32>
    %c2_i32 = arith.constant 2 : i32
    %55 = vector.broadcast %c2_i32 : i32 to vector<1x128xi32>
    %56 = arith.cmpi eq, %11, %55 : vector<1x128xi32>
    %57 = arith.select %56, %20, %51 : vector<1x128xi1>, vector<1x128xf32>
    %c2 = arith.constant 2 : index
    %58 = memref.load %arg4[%c2] : memref<5xf32, #tpu.memory_space<smem>>
    %59 = vector.broadcast %58 : f32 to vector<1x128xf32>
    %60 = arith.select %56, %59, %54 : vector<1x128xi1>, vector<1x128xf32>
    %c3_i32 = arith.constant 3 : i32
    %61 = vector.broadcast %c3_i32 : i32 to vector<1x128xi32>
    %62 = arith.cmpi eq, %11, %61 : vector<1x128xi32>
    %63 = arith.select %62, %21, %57 : vector<1x128xi1>, vector<1x128xf32>
    %c3 = arith.constant 3 : index
    %64 = memref.load %arg4[%c3] : memref<5xf32, #tpu.memory_space<smem>>
    %65 = vector.broadcast %64 : f32 to vector<1x128xf32>
    %66 = arith.select %62, %65, %60 : vector<1x128xi1>, vector<1x128xf32>
    %c4_i32 = arith.constant 4 : i32
    %67 = vector.broadcast %c4_i32 : i32 to vector<1x128xi32>
    %68 = arith.cmpi eq, %11, %67 : vector<1x128xi32>
    %69 = arith.select %68, %22, %63 : vector<1x128xi1>, vector<1x128xf32>
    %c4 = arith.constant 4 : index
    %70 = memref.load %arg4[%c4] : memref<5xf32, #tpu.memory_space<smem>>
    %71 = vector.broadcast %70 : f32 to vector<1x128xf32>
    %72 = arith.select %68, %71, %66 : vector<1x128xi1>, vector<1x128xf32>
    %73 = arith.subf %69, %26 : vector<1x128xf32>
    %74 = math.exp %73 : vector<1x128xf32>
    %75 = arith.divf %74, %40 : vector<1x128xf32>
    %cst_12 = arith.constant 1.000000e-10 : f32
    %76 = vector.broadcast %cst_12 : f32 to vector<1x128xf32>
    %77 = arith.addf %75, %76 : vector<1x128xf32>
    %78 = math.log %77 : vector<1x128xf32>
    %cst_13 = arith.constant 1.000000e+00 : f32
    %79 = vector.broadcast %cst_13 : f32 to vector<1x128xf32>
    %80 = arith.subf %79, %77 : vector<1x128xf32>
    %cst_14 = arith.constant 1.000000e+00 : f32
    %81 = vector.broadcast %cst_14 : f32 to vector<1x128xf32>
    %82 = arith.mulf %81, %80 : vector<1x128xf32>
    %83 = arith.mulf %82, %80 : vector<1x128xf32>
    %cst_15 = arith.constant 0.000000e+00 : f32
    %84 = vector.broadcast %cst_15 : f32 to vector<1x128xf32>
    %85 = arith.subf %84, %83 : vector<1x128xf32>
    %86 = arith.mulf %85, %78 : vector<1x128xf32>
    %cst_16 = arith.constant 0.000000e+00 : f32
    %87 = vector.broadcast %cst_16 : f32 to vector<1x128xf32>
    %c0_17 = arith.constant 0 : index
    %c0_18 = arith.constant 0 : index
    %88 = vector.load %arg6[%c0_17, %c0_18] : memref<1x1xf32, #tpu.memory_space<vmem>>, vector<1x1xf32>
    %89 = arith.select %17, %86, %87 : vector<1x128xi1>, vector<1x128xf32>
    %cst_19 = arith.constant dense<0.000000e+00> : vector<1xf32>
    %90 = vector.multi_reduction <add>, %89, %cst_19 [1] : vector<1x128xf32> to vector<1xf32>
    %91 = vector.shape_cast %90 : vector<1xf32> to vector<1x1xf32>
    %92 = arith.addf %88, %91 : vector<1x1xf32>
    %c0_20 = arith.constant 0 : index
    %c0_21 = arith.constant 0 : index
    %93 = vector.load %arg6[%c0_20, %c0_21] : memref<1x1xf32, #tpu.memory_space<vmem>>, vector<1x1xf32>
    tpu.vector_store %arg6[%c0_20, %c0_21], %92 {strides = array<i32>} : memref<1x1xf32, #tpu.memory_space<vmem>>, vector<1x1xf32>,
    %c0_22 = arith.constant 0 : index
    %c0_23 = arith.constant 0 : index
    %94 = vector.load %arg7[%c0_22, %c0_23] : memref<1x1xf32, #tpu.memory_space<vmem>>, vector<1x1xf32>
    %95 = arith.select %17, %72, %87 : vector<1x128xi1>, vector<1x128xf32>
    %cst_24 = arith.constant dense<0.000000e+00> : vector<1xf32>
    %96 = vector.multi_reduction <add>, %95, %cst_24 [1] : vector<1x128xf32> to vector<1xf32>
    %97 = vector.shape_cast %96 : vector<1xf32> to vector<1x1xf32>
    %98 = arith.addf %94, %97 : vector<1x1xf32>
    %c0_25 = arith.constant 0 : index
    %c0_26 = arith.constant 0 : index
    %99 = vector.load %arg7[%c0_25, %c0_26] : memref<1x1xf32, #tpu.memory_space<vmem>>, vector<1x1xf32>
    tpu.vector_store %arg7[%c0_25, %c0_26], %98 {strides = array<i32>} : memref<1x1xf32, #tpu.memory_space<vmem>>, vector<1x1xf32>,
    %100 = arith.extui %5 : i1 to i32
    %c0_i32_27 = arith.constant 0 : i32
    %101 = arith.cmpi ne, %100, %c0_i32_27 : i32
    scf.if %101 {
      %c0_28 = arith.constant 0 : index
      %c0_29 = arith.constant 0 : index
      %102 = vector.load %arg7[%c0_28, %c0_29] : memref<1x1xf32, #tpu.memory_space<vmem>>, vector<1x1xf32>
      %cst_30 = arith.constant 0.001953125 : f32
      %103 = vector.broadcast %cst_30 : f32 to vector<1x1xf32>
      %104 = arith.mulf %102, %103 : vector<1x1xf32>
      %c0_31 = arith.constant 0 : index
      %c0_32 = arith.constant 0 : index
      %105 = vector.load %arg6[%c0_31, %c0_32] : memref<1x1xf32, #tpu.memory_space<vmem>>, vector<1x1xf32>
      %cst_33 = arith.constant 0.001953125 : f32
      %106 = vector.broadcast %cst_33 : f32 to vector<1x1xf32>
      %107 = arith.mulf %105, %106 : vector<1x1xf32>
      %108 = arith.mulf %104, %107 : vector<1x1xf32>
      %c0_34 = arith.constant 0 : index
      %c0_35 = arith.constant 0 : index
      %109 = vector.load %arg5[%c0_34, %c0_35] : memref<1x1xf32, #tpu.memory_space<vmem>>, vector<1x1xf32>
      tpu.vector_store %arg5[%c0_34, %c0_35], %108 {strides = array<i32>} : memref<1x1xf32, #tpu.memory_space<vmem>>, vector<1x1xf32>,
    } else {
    }
    return
  }
  func.func @transform_0(%arg0: i32, %arg1: i32) -> (i32, i32, i32) {
    %c0_i32 = arith.constant 0 : i32
    %c0_i32_0 = arith.constant 0 : i32
    return %arg0, %c0_i32, %arg1 : i32, i32, i32
  }
  func.func @transform_1(%arg0: i32, %arg1: i32) -> (i32, i32, i32) {
    %c0_i32 = arith.constant 0 : i32
    %c0_i32_0 = arith.constant 0 : i32
    return %arg0, %c0_i32, %arg1 : i32, i32, i32
  }
  func.func @transform_2(%arg0: i32, %arg1: i32) -> i32 {
    %c0_i32 = arith.constant 0 : i32
    %c0_i32_0 = arith.constant 0 : i32
    return %c0_i32 : i32
  }
  func.func @transform_3(%arg0: i32, %arg1: i32) -> (i32, i32) {
    %c0_i32 = arith.constant 0 : i32
    %c0_i32_0 = arith.constant 0 : i32
    %c0_i32_1 = arith.constant 0 : i32
    return %c0_i32, %c0_i32_0 : i32, i32
  }
}

</mosaic_0001>

<bundles_post_ra>
// kernel: tpu_custom_call.1
= control target key start
LH: loop header
LB: loop body
LE: loop exit
PB: predicated region body
PF: predicated region fallthrough
CT: control target
= control target key end

     0   :  { %8 = vsyncpa [#allocation6], 0  ;;  %s803_s0 = inlined_call_operand.vmem [shape: f32[2,5,256], index: 0, kind: input, shape index: {}]   ;;  %s804_s1 = inlined_call_operand.vmem [shape: s32[2,1,256], index: 1, kind: input, shape index: {}]   ;;  %s805_s2 = inlined_call_operand.vmem [shape: f32[5], index: 2, kind: input, shape index: {}]   ;;  %s806_s3 = inlined_call_operand.hbm [shape: f32[1,1], index: 3, kind: output, shape index: {}]  }
   0x1   :  { %9 = vsyncpa [#allocation5], 0  ;;  %s686_s12 = smov 0   ;;  %s688_s13 = smov 0  }
   0x2   :  { %s690_s14 = smov 0   ;;  %s692_s15 = smov 0  }
   0x3   :  { %s694_s16 = smov 0  }
   0x4 LB: > { %s479_s17 = sadd.s32 4294967295, %s661_s16   ;;  %s24_s18 = sadd.s32 1, %s653_s14  ;;  %s661_s16 = sphi %s694_s16, %s15_s16   ;;  %s657_s15 = sphi %s692_s15, %s811_s15   ;;  %s653_s14 = sphi %s690_s14, %s810_s14   ;;  %s649_s13 = sphi %s688_s13, %s809_s13   ;;  %s645_s12 = sphi %s686_s12, %s808_s12  }
   0x5   : > { %p25_p0 = scmp.ge.s32.totalorder %s24_s18, 2  ;;  %s27_s19 = sadd.s32 1, %s657_s15 }
   0x6   : > { %p480_p1 = scmp.ge.s32.totalorder %s661_s16, 1  ;;  %p130_p2 = scmp.lt.s32.totalorder %s661_s16, 5 }
   0x7   : > { %s813_s18 = smov (%p25_p0, %s24_s18), 0  ;;  %s815_s19 = smov (!%p25_p0, %s27_s19), %s657_s15 }
   0x8   : > { %p131_p3 = pnand %p480_p1, %p130_p2  ;;  %p29_p4 = scmp.ge.s32.totalorder %s815_s19, 2 }
   0x9   : > { %p509_p5 = scmp.eq.s32.totalorder %s479_s17, 0  ;;  %s142_s22 = sshll.u32 %s805_s2, 4  ;;  %s143_s22 = int_to_ptr.vmem [resolvable:$true] %s142_s22 }
   0xa   : > { %p505_p6 = pneg %p131_p3  ;;  %s817_s19 = smov (%p29_p4, %s815_s19), 0 }
   0xb   : > { %s663_s23 = smov [#allocation4]   ;;  %176 = sbr.rel (%p131_p3) target bundleno = 248 (0xf8), region = 32 }
   0xc   : > { %p506_p7 = pnand %p509_p5, %p505_p6 }
   0xe   : > { %508 = dma.vmem_to_smem (!%p506_p7), %s143_s22, 16, %s663_s23, [#allocation6]  }
  0x10   : > { %636 = dma.done.wait (%p509_p5), [#allocation6], 16  }
  0x11   : > { %638 = vsyncadd (%p509_p5), [#allocation6], 4294967280 }
  0x12   : > { %183 = sfence }
  0x13   : > { %p207_p8 = scmp.lt.s32.totalorder %s649_s13, 1  ;;  %p209_p9 = scmp.lt.s32.totalorder %s645_s12, 1 }
  0x14   : > { %p222_p10 = scmp.eq.s32.totalorder %s649_s13, 0  ;;  %p223_p11 = scmp.eq.s32.totalorder %s645_s12, 0 }
  0x15   : > { %s208_s24 = scalar_select %p207_p8, %s649_s13, 1 }
  0x16   : > { %s210_s25 = scalar_select %p209_p9, %s645_s12, 1 }
  0x17   : > { %s485_s26 = sshll.u32 %s208_s24, 1  ;;  %p224_p12 = pnand %p223_p11, %p222_p10 }
  0x18   : > { %s732_s27 = sadd.s32 %s485_s26, %s210_s25  ;;  %p226_p13 = scmp.eq.s32.totalorder %s649_s13, 1 }
  0x19   : > { %s486_s28 = sshll.u32 %s732_s27, 3  ;;  %s221_s4 = scalar_lea.vmem %s804_s1, %s732_s27 }
  0x1a   : > { %s214_s7 = scalar_lea.vmem %s803_s0, %s486_s28  ;;  %p227_p0 = scmp.eq.s32.totalorder %s645_s12, 1 }
  0x1b   : > { %231 = sbr.rel (%p224_p12) target bundleno = 35 (0x23), region = 40 }
  0x1c   : > { %p744_p1 = pnand %p227_p0, %p226_p13 }
  0x20   : > { %vm232_vm0 = vcmask 0   ;;  %v664_v0 = vmov 0.0  }
  0x21   : > { %233 = vst.msk [vmem:[#allocation2] sm:$0x1] %vm232_vm0, %v664_v0 }
  0x22   : > { %234 = vst.msk [vmem:[#allocation3] sm:$0x1] %vm232_vm0, %v664_v0 }
  0x23 PF: > { %v235_v1 = vld [vmem:[%s214_s7] sm:$0x1f]  ;;  %s298_s11 = sld [smem:[#allocation4]]  ;;  %v237_v59 = vlaneseq  ;;  %s488_s21 = sshll.u32 %s645_s12, 7  ;;  %vm364_vm11 = vcmask 1040384   ;;  %vm369_vm12 = vcmask 0  }
  0x24   : > { %v244_v2 = vrot.slane %v235_v1, 1  ;;  %v247_v3 = vrot.slane %v235_v1, 2  ;;  %302 = vst [vmem:[#allocation1] sm:$0xff] %v235_v1  ;;  %v250_v5 = vrot.slane %v235_v1, 3  ;;  %v253_v7 = vrot.slane %v235_v1, 4  ;;  %s489_s13 = sld [smem:[#allocation4 + $0x1]] }
  0x25   : > { %v753_v20 = vld [vmem:[%s221_s4] sm:$0x1]  ;;  %s490_s20 = sld [smem:[#allocation4 + $0x2]]  ;;  %v238_v0 = vand.u32 127, %v237_v59 }
  0x26   : > { %v246_v4 = vmax.f32 %v235_v1, %v244_v2  ;;  %vm296_vm1 = vcmp.eq.s32.totalorder %v753_v20, 0  ;;  %vm301_vm2 = vcmp.eq.s32.totalorder %v753_v20, 1  ;;  %vm310_vm3 = vcmp.eq.s32.totalorder %v753_v20, 2  ;;  %s491_s22 = sld [smem:[#allocation4 + $0x3]] }
  0x27   : > { %v297_v27 = vsel %vm296_vm1, %v235_v1, 0.0  ;;  %vm319_vm4 = vcmp.eq.s32.totalorder %v753_v20, 3  ;;  %vm328_vm5 = vcmp.eq.s32.totalorder %v753_v20, 4  ;;  %s492_s23 = sld [smem:[#allocation4 + $0x4]] }
  0x28   : > { %v249_v6 = vmax.f32 %v246_v4, %v247_v3  ;;  %v240_v4 = vstv %s488_s21 }
  0x29   : > { %v299_v62 = vstv %s298_s11 }
  0x2a   : > { %v252_v8 = vmax.f32 %v249_v6, %v250_v5  ;;  %v300_v2 = vsel %vm296_vm1, %v299_v62, 0.0  ;;  %v308_v3 = vstv %s489_s13 }
  0x2b   : > { %v304_v9 = vld [vmem:[#allocation1 + $0x1] ss:$9 sm:$0xff]  ;;  %v309_v6 = vsel %vm301_vm2, %v308_v3, %v300_v2 }
  0x2c   : > { %v255_v10 = vmax.f32 %v252_v8, %v253_v7  ;;  %311 = vst [vmem:[#allocation1] sm:$0xff] %v235_v1  ;;  %v306_v32 = vsel %vm301_vm2, %v304_v9, %v297_v27  ;;  %v317_v7 = vstv %s490_s20  ;;  %v241_v8 = vadd.s32 %v240_v4, %v238_v0 }
  0x2e   : > { %v256_v11 = vsub.f32 %v235_v1, %v255_v10  ;;  %v260_v12 = vrot.slane %v255_v10, 7  ;;  %v269_v13 = vrot.slane %v255_v10, 6  ;;  %v278_v14 = vrot.slane %v255_v10, 5 }
  0x2f   : > { %v287_v15 = vrot.slane %v255_v10, 4  ;;  %vm242_vm10 = vcmp.lt.s32.totalorder %v241_v8, 256 }
  0x30   : > { %v257_v16 = vmul.f32 1.442695, %v256_v11  ;;  %v262_v17 = vsub.f32 %v235_v1, %v260_v12  ;;  %v271_v18 = vsub.f32 %v235_v1, %v269_v13  ;;  %v280_v19 = vsub.f32 %v235_v1, %v278_v14 }
  0x31   : > { %v289_v21 = vsub.f32 %v235_v1, %v287_v15  ;;  %v318_v11 = vsel %vm310_vm3, %v317_v7, %v309_v6  ;;  %v326_v12 = vstv %s491_s22 }
  0x32   : > { %v263_v22 = vmul.f32 1.442695, %v262_v17  ;;  %v272_v23 = vmul.f32 1.442695, %v271_v18  ;;  %v281_v24 = vmul.f32 1.442695, %v280_v19  ;;  %556 = vpow2.f32 %v257_v16 }
  0x33   : > { %v290_v25 = vmul.f32 1.442695, %v289_v21  ;;  %v313_v26 = vld [vmem:[#allocation1 + $0x2] ss:$9 sm:$0xff]  ;;  %v327_v15 = vsel %vm319_vm4, %v326_v12, %v318_v11  ;;  %v335_v16 = vstv %s492_s23 }
  0x34   : > { %558 = vpow2.f32 %v263_v22  ;;  %320 = vst [vmem:[#allocation1] sm:$0xff] %v235_v1  ;;  %v315_v39 = vsel %vm310_vm3, %v313_v26, %v306_v32  ;;  %v336_v19 = vsel %vm328_vm5, %v335_v16, %v327_v15  ;;  %v371_v26 = vld [vmem:[#allocation3] sm:$0x1] }
  0x35   : > { %560 = vpow2.f32 %v272_v23  ;;  %v372_v21 = vsel %vm242_vm10, %v336_v19, 0.0  ;;  %v362_v23 = vld [vmem:[#allocation2] sm:$0x1] }
  0x36   : > { %562 = vpow2.f32 %v281_v24  ;;  %v373_v22 = vsel %vm364_vm11, %v372_v21, 0.0 }
  0x37   : > { %564 = vpow2.f32 %v290_v25 }
  0x38   : > { %v557_v28 = vpop.eup %556 }
  0x3a   : > { %v559_v29 = vpop.eup %558 }
  0x3b   : > { %v561_v30 = vpop.eup %560  ;;  %v266_v31 = vrot.slane %v559_v29, 1  ;;  %v322_v33 = vld [vmem:[#allocation1 + $0x3] ss:$9 sm:$0xff] }
  0x3c   : > { %v563_v34 = vpop.eup %562  ;;  %v275_v35 = vrot.slane %v561_v30, 2  ;;  %329 = vst [vmem:[#allocation1] sm:$0xff] %v235_v1  ;;  %v324_v43 = vsel %vm319_vm4, %v322_v33, %v315_v39 }
  0x3d   : > { %v565_v36 = vpop.eup %564  ;;  %v268_v37 = vadd.f32 %v557_v28, %v266_v31  ;;  %v284_v38 = vrot.slane %v563_v34, 3 }
  0x3e   : > { %v293_v41 = vrot.slane %v565_v36, 4 }
  0x3f   : > { %v277_v40 = vadd.f32 %v275_v35, %v268_v37 }
  0x41   : > { %v286_v42 = vadd.f32 %v284_v38, %v277_v40 }
  0x43   : > { %v295_v44 = vadd.f32 %v293_v41, %v286_v42  ;;  %v331_v45 = vld [vmem:[#allocation1 + $0x4] ss:$9 sm:$0xff] }
  0x44   : > { %v333_v46 = vsel %vm328_vm5, %v331_v45, %v324_v43 }
  0x45   : > { %v337_v47 = vsub.f32 %v333_v46, %v255_v10  ;;  %566 = vrcp.f32 %v295_v44  ;;  %v351_v51 = vand.u32 2147483648, %v295_v44  ;;  %vm345_vm6 = vweird.f32 %v295_v44 }
  0x46   : > { %v349_v53 = vand.u32 2147483647, %v295_v44 }
  0x47   : > { %v338_v48 = vmul.f32 1.442695, %v337_v47  ;;  %v352_v55 = vor.u32 1.1754944e-38, %v351_v51 }
  0x48   : > { %vm350_vm9 = vcmp.eq.f32.partialorder %v349_v53, 8.507059e+37 }
  0x49   : > { %568 = vpow2.f32 %v338_v48 }
  0x4b   : > { %v567_v49 = vpop.eup %566 }
  0x4c   : > { %v341_v50 = vmul.f32 %v567_v49, %v295_v44  ;;  %vm346_vm7 = vweird.f32 %v567_v49 }
  0x4d   : > { %vm347_vm8 = vmor %vm345_vm6, %vm346_vm7 }
  0x4e   : > { %v342_v52 = vsub.f32 1.0, %v341_v50 }
  0x4f   : > { %v569_v57 = vpop.eup %568 }
  0x50   : > { %v343_v54 = vmul.f32 %v567_v49, %v342_v52 }
  0x52   : > { %v344_v56 = vadd.f32 %v567_v49, %v343_v54 }
  0x54   : > { %v348_v58 = vsel %vm347_vm8, %v567_v49, %v344_v56 }
  0x55   : > { %v353_v60 = vsel %vm350_vm9, %v352_v55, %v348_v58 }
  0x56   : > { %v354_v61 = vmul.f32 %v569_v57, %v353_v60 }
  0x58   : > { %v355_v63 = vadd.f32 1e-10, %v354_v61 }
  0x5a   : > { %570 = vlog2.f32 %v355_v63  ;;  %v358_v1 = vsub.f32 1.0, %v355_v63 }
  0x5c   : > { %v359_v5 = vmul.f32 %v358_v1, %v358_v1 }
  0x5e   : > { %v360_v9 = vsub.f32 0.0, %v359_v5 }
  0x60   : > { %v571_v10 = vpop.eup %570 }
  0x61   : > { %v357_v13 = vmul.f32 0.6931472, %v571_v10 }
  0x63   : > { %v361_v14 = vmul.f32 %v360_v9, %v357_v13 }
  0x65   : > { %v363_v17 = vsel %vm242_vm10, %v361_v14, 0.0 }
  0x66   : > { %v365_v18 = vsel %vm364_vm11, %v363_v17, 0.0 }
  0x67   : > { %366 = vadd.xlane.f32.xlu0 %v365_v18 }
  0x6f   : > { %374 = vadd.xlane.f32.xlu0 %v373_v22 }
  0xda   : > { %v367_v24 = vpop.xlane.xlu0 %366 }
  0xdb   : > { %v368_v25 = vadd.f32 %v367_v24, %v362_v23 }
  0xdd   : > { %370 = vst.msk [vmem:[#allocation2] sm:$0x1] %vm369_vm12, %v368_v25 }
  0xe1   : > { %379 = sbr.rel (%p744_p1) target bundleno = 242 (0xf2), region = 44 }
  0xe2   : > { %v375_v27 = vpop.xlane.xlu0 %374 }
  0xe3   : > { %v376_v28 = vadd.f32 %v375_v27, %v371_v26 }
  0xe5   : > { %377 = vst.msk [vmem:[#allocation3] sm:$0x1] %vm369_vm12, %v376_v28 }
  0xe6   : > { %v382_v30 = vld [vmem:[#allocation2] sm:$0x1] }
  0xe7   : > { %v383_v31 = vmul.f32 0.001953125, %v382_v30 }
  0xec   : > { %v380_v29 = vld [vmem:[#allocation3] sm:$0x1] }
  0xed   : > { %v381_v20 = vmul.f32 0.001953125, %v380_v29 }
  0xef   : > { %v384_v32 = vmul.f32 %v383_v31, %v381_v20 }
  0xf1   : > { %385 = vst.msk [vmem:[#allocation7] sm:$0x1] %vm369_vm12, %v384_v32 }
  0xf2 PF: > { %p511_p2 = scmp.eq.s32.totalorder %s479_s17, 3  ;;  %s394_s25 = sshll.u32 %s806_s3, 4  ;;  %s395_s25 = int_to_ptr.hbm [resolvable:$true] %s394_s25 }
  0xf3   : > { %s665_s26 = smov [#allocation7]  }
  0xf4   : > { %s392_s27 = sshll.u32 %s665_s26, 4  ;;  %s393_s27 = int_to_ptr.vmem [resolvable:$true] %s392_s27 }
  0xf5   : > { %502 = dma.vmem_to_hbm [thread:$0]  (%p511_p2), %s393_s27, 16, %s395_s25, [#allocation5]  }
  0xf6   : > { %640 = dma.done.wait (%p511_p2), [#allocation5], 16  }
  0xf7   : > { %642 = vsyncadd (%p511_p2), [#allocation5], 4294967280 }
  0xf8 PF: > { %s15_s16 = sadd.s32 1, %s661_s16   ;;  %s808_s12 = smov %s653_s14 }
  0xf9   : > { %p12_p3 = scmp.ge.s32.totalorder %s15_s16, 6   ;;  %s809_s13 = smov %s657_s15 }
  0xfa   : > { %s810_s14 = smov %s813_s18  ;;  %s811_s15 = smov %s817_s19 }
  0xfb   :  { %14 = sbr.rel (!%p12_p3) target bundleno = 4 (0x4), region = 79 }
 0x100   :  { %408 = vsyncpa [#allocation5], 1 }
 0x101   :  { %410 = vsyncpa [#allocation5 + $0x1], 1 }
 0x102   :  { %411 = vsyncpa [#allocation6], 1 }
 0x103   :  { %413 = vsyncpa [#allocation6 + $0x1], 1 }

</bundles_post_ra>
